<compile_context>
chip_gen: v7x
topology: tpu7x:2x2x1
jax: 0.10.0
libtpu: 0.0.40
codegen_flags: <defaults>
</compile_context>

<pallas_src>
import functools
import math

import jax
import jax.numpy as jnp
from jax import lax
from jax.experimental import pallas as pl
from jax.experimental.pallas import tpu as pltpu


def _round_up(x, m):
    return ((x + m - 1) // m) * m


def _cdiv(a, b):
    return -(-a // b)


def mlp_critic_kernel(x_ref, w1_ref, b1_ref, w2_ref, b2_ref, w3_ref, b3_ref,
                      out_ref, *, precision):
    # x_ref : [TB, D]   obs in native PyTorch layout (batch on sublanes, features on lanes)
    # w1_ref: [H1, D]   b1_ref: [H1, 1]
    # w2_ref: [H2, H1]  b2_ref: [H2, 1]
    # w3_ref: [H2, 1]   final layer as a column (VPU mul + sublane reduce)
    # b3_ref: [1]       scalar in SMEM
    # out   : [1, TB]   lane-dense full-width store
    x = x_ref[...]

    # Layer 1: NT matmul, contracting the feature dim of BOTH operands.
    # Result is [H1, TB] -> batch stays on the 128-wide lane axis for the rest of the net.
    h1 = jnp.tanh(
        lax.dot_general(w1_ref[...], x, (((1,), (1,)), ((), ())),
                        preferred_element_type=jnp.float32,
                        precision=precision)
        + b1_ref[...]
    )                                                                  # [H1, TB] f32

    # Layer 2: plain [H2,H1] @ [H1,TB] MXU matmul (cast back to the weights' compute dtype).
    h2 = jnp.tanh(
        jnp.dot(w2_ref[...], h1.astype(w2_ref.dtype),
                preferred_element_type=jnp.float32,
                precision=precision)
        + b2_ref[...]
    )                                                                  # [H2, TB] f32

    # Final Linear(H2, 1): broadcast-multiply (VPU) + sublane reduce (XLU) instead of a
    # width-1 MXU matmul; bias comes from SMEM as a scalar.
    v = jnp.sum(h2 * w3_ref[...], axis=0, keepdims=True) + b3_ref[0]   # [1, TB]
    out_ref[...] = v.astype(out_ref.dtype)


def mlp_critic_forward(obs, params, *, tile_b=16384, compute_dtype=jnp.float32):
    """obs: [B, D] float32 (PyTorch layout). Returns value estimates of shape [B]."""
    w1, b1, w2, b2, w3, b3 = params  # w*: [out, in] (PyTorch Linear layout), b*: [out]
    B, D = obs.shape
    H1 = w1.shape[0]
    H2 = w2.shape[0]

    itemsize = jnp.dtype(compute_dtype).itemsize

    # --- VMEM-aware cap on the batch tile (v7x: 64 MiB physical / 32 MiB scoped default).
    # Per batch element: double-buffered obs row + f32 h1/h2 temporaries + double-buffered out.
    per_elem_bytes = 2 * D * itemsize + (H1 + H2) * 4 + 2 * 4
    vmem_budget = 24 << 20                                   # headroom under 32 MiB scoped
    tb_cap = max(128, (vmem_budget // per_elem_bytes) // 128 * 128)
    tile_b = min(tile_b, tb_cap)

    # --- batch tiling: the batch lands on the 128-wide lane axis of the output, so tiles
    # are 128-multiples. Keep grid >= 2 (ideally 4) whenever the padded batch allows it so
    # both v7x TensorCores get work and the obs HBM->VMEM DMA overlaps compute.
    B_pad128 = _round_up(B, 128)
    if B_pad128 <= tile_b:
        if B_pad128 >= 4 * 128:
            tb = _round_up(_cdiv(B_pad128, 4), 128)
        elif B_pad128 >= 2 * 128:
            tb = _round_up(_cdiv(B_pad128, 2), 128)
        else:
            tb = 128
    else:
        tb = _round_up(tile_b, 128)
    B_pad = _round_up(B, tb)
    grid = B_pad // tb

    # obs stays in its native [B, D] layout (no host-side transpose pass over HBM); the
    # ragged batch tail is zero-padded only when B is not already a tile multiple. Padded
    # rows produce finite garbage (tanh of biases) and are sliced off below.
    obs_p = obs if B_pad == B else jnp.pad(obs, ((0, B_pad - B), (0, 0)))

    xk = obs_p.astype(compute_dtype)
    w1k = w1.astype(compute_dtype)
    w2k = w2.astype(compute_dtype)
    b1c = b1.reshape(H1, 1).astype(jnp.float32)
    b2c = b2.reshape(H2, 1).astype(jnp.float32)
    w3c = w3.reshape(H2, 1).astype(jnp.float32)   # [1,H2] -> column [H2,1]
    b3s = b3.reshape(1).astype(jnp.float32)       # SMEM scalar

    # Explicit MXU precision: exact-f32 path uses HIGHEST (free at K=16/32); the bf16
    # path deliberately uses the native bf16 MXU route.
    precision = (lax.Precision.HIGHEST
                 if jnp.dtype(compute_dtype) == jnp.dtype(jnp.float32)
                 else lax.Precision.DEFAULT)

    cost = pl.CostEstimate(
        flops=2 * B_pad * (D * H1 + H1 * H2 + H2),
        transcendentals=B_pad * (H1 + H2),
        bytes_accessed=(xk.size * itemsize
                        + (w1k.size + w2k.size) * itemsize
                        + (H1 + H2 + H2 + 1) * 4
                        + B_pad * 4),
    )

    v = pl.pallas_call(
        functools.partial(mlp_critic_kernel, precision=precision),
        out_shape=jax.ShapeDtypeStruct((1, B_pad), jnp.float32),
        grid_spec=pltpu.PrefetchScalarGridSpec(
            num_scalar_prefetch=0,
            grid=(grid,),
            in_specs=[
                pl.BlockSpec((tb, D), lambda i: (i, 0)),    # obs tile, native layout (pipelined)
                pl.BlockSpec((H1, D), lambda i: (0, 0)),    # w1 (resident)
                pl.BlockSpec((H1, 1), lambda i: (0, 0)),    # b1 column
                pl.BlockSpec((H2, H1), lambda i: (0, 0)),   # w2 (resident)
                pl.BlockSpec((H2, 1), lambda i: (0, 0)),    # b2 column
                pl.BlockSpec((H2, 1), lambda i: (0, 0)),    # w3 column
                pl.BlockSpec(memory_space=pltpu.MemorySpace.SMEM),  # b3 scalar
            ],
            out_specs=pl.BlockSpec((1, tb), lambda i: (0, i)),
        ),
        compiler_params=pltpu.CompilerParams(
            dimension_semantics=("parallel",),   # shards batch tiles across v7x TCs
        ),
        cost_estimate=cost,
    )(xk, w1k, b1c, w2k, b2c, w3c, b3s)

    return v[0, :B]  # squeeze(-1) + drop batch padding


def init_linear(key, fan_in, fan_out):
    """nn.Linear default init: U(-1/sqrt(fan_in), +1/sqrt(fan_in)); weight kept [out, in]."""
    kw, kb = jax.random.split(key)
    bound = 1.0 / math.sqrt(fan_in)
    w = jax.random.uniform(kw, (fan_out, fan_in), jnp.float32, -bound, bound)
    b = jax.random.uniform(kb, (fan_out,), jnp.float32, -bound, bound)
    return w, b


if __name__ == "__main__":
    key = jax.random.PRNGKey(0)
    k_obs, k1, k2, k3 = jax.random.split(key, 4)

    # Small shapes consistent with the MLP path of MLPCritic; B=256 exercises the
    # never-grid=1 small-batch branch (2 tiles of 128, pipelined, no padding needed).
    B, obs_dim = 256, 16
    hidden_sizes = (32, 32)

    w1, b1 = init_linear(k1, obs_dim, hidden_sizes[0])
    w2, b2 = init_linear(k2, hidden_sizes[0], hidden_sizes[1])
    w3, b3 = init_linear(k3, hidden_sizes[1], 1)
    params = (w1, b1, w2, b2, w3, b3)

    obs = jax.random.normal(k_obs, (B, obs_dim), jnp.float32)

    v = mlp_critic_forward(obs, params)
    jax.block_until_ready(v)

    # Pure-JAX reference of the same forward pass (PyTorch [out,in] weights); explicit
    # HIGHEST precision to match the kernel's explicit f32 MXU path.
    ref = jnp.tanh(jnp.dot(obs, w1.T, precision=lax.Precision.HIGHEST) + b1)
    ref = jnp.tanh(jnp.dot(ref, w2.T, precision=lax.Precision.HIGHEST) + b2)
    ref = (jnp.dot(ref, w3.T, precision=lax.Precision.HIGHEST) + b3)[:, 0]

    assert v.shape == (B,)
    assert jnp.allclose(v, ref, atol=1e-5, rtol=1e-5)

    print("KERNEL_OK")
</pallas_src>

<mosaic_0001>
module attributes {stable_mosaic.version = 11 : i64} {
  func.func @mlp_critic_kernel(%arg0: i32, %arg1: memref<128x16xf32, #tpu.memory_space<vmem>>, %arg2: memref<32x16xf32, #tpu.memory_space<vmem>>, %arg3: memref<32x1xf32, #tpu.memory_space<vmem>>, %arg4: memref<32x32xf32, #tpu.memory_space<vmem>>, %arg5: memref<32x1xf32, #tpu.memory_space<vmem>>, %arg6: memref<32x1xf32, #tpu.memory_space<vmem>>, %arg7: memref<1xf32, #tpu.memory_space<smem>>, %arg8: memref<1x128xf32, #tpu.memory_space<vmem>>) attributes {dimension_semantics = [#tpu.dimension_semantics<parallel>], iteration_bounds = array<i64: 2>, scalar_prefetch = 0 : i64, scratch_operands = 0 : i64, tpu.core_type = #tpu.core_type<tc>, window_params = [{transform_indices = @transform_0, window_bounds = array<i64: 128, 16>}, {pipeline_mode = #tpu.pipeline_mode<synchronous>, transform_indices = @transform_1, window_bounds = array<i64: 32, 16>}, {pipeline_mode = #tpu.pipeline_mode<synchronous>, transform_indices = @transform_2, window_bounds = array<i64: 32, 1>}, {pipeline_mode = #tpu.pipeline_mode<synchronous>, transform_indices = @transform_3, window_bounds = array<i64: 32, 32>}, {pipeline_mode = #tpu.pipeline_mode<synchronous>, transform_indices = @transform_4, window_bounds = array<i64: 32, 1>}, {pipeline_mode = #tpu.pipeline_mode<synchronous>, transform_indices = @transform_5, window_bounds = array<i64: 32, 1>}, {transform_indices = @transform_6, window_bounds = array<i64: 1>}, {transform_indices = @transform_7, window_bounds = array<i64: 1, 128>}]} {
    %c0 = arith.constant 0 : index
    %c0_0 = arith.constant 0 : index
    %0 = vector.load %arg1[%c0, %c0_0] : memref<128x16xf32, #tpu.memory_space<vmem>>, vector<128x16xf32>
    %c0_1 = arith.constant 0 : index
    %c0_2 = arith.constant 0 : index
    %1 = vector.load %arg2[%c0_1, %c0_2] : memref<32x16xf32, #tpu.memory_space<vmem>>, vector<32x16xf32>
    %cst = arith.constant dense<0.000000e+00> : vector<32x128xf32>
    %2 = tpu.matmul %1, %0, %cst {dimension_numbers = #tpu.dot_dimension_numbers<[1], [1], [0], [0], [0, 0, 1, 0], [], []>, precision = #tpu.contract_precision<fp32>} : vector<32x16xf32>, vector<128x16xf32>, vector<32x128xf32> -> vector<32x128xf32>
    %c0_3 = arith.constant 0 : index
    %c0_4 = arith.constant 0 : index
    %3 = vector.load %arg3[%c0_3, %c0_4] : memref<32x1xf32, #tpu.memory_space<vmem>>, vector<32x1xf32>
    %4 = vector.broadcast %3 : vector<32x1xf32> to vector<32x128xf32>
    %5 = arith.addf %2, %4 : vector<32x128xf32>
    %6 = math.tanh %5 : vector<32x128xf32>
    %c0_5 = arith.constant 0 : index
    %c0_6 = arith.constant 0 : index
    %7 = vector.load %arg4[%c0_5, %c0_6] : memref<32x32xf32, #tpu.memory_space<vmem>>, vector<32x32xf32>
    %cst_7 = arith.constant dense<0.000000e+00> : vector<32x128xf32>
    %8 = tpu.matmul %7, %6, %cst_7 {dimension_numbers = #tpu.dot_dimension_numbers<[1], [0], [0], [1], [0, 0, 1, 1], [], []>, precision = #tpu.contract_precision<fp32>} : vector<32x32xf32>, vector<32x128xf32>, vector<32x128xf32> -> vector<32x128xf32>
    %c0_8 = arith.constant 0 : index
    %c0_9 = arith.constant 0 : index
    %9 = vector.load %arg5[%c0_8, %c0_9] : memref<32x1xf32, #tpu.memory_space<vmem>>, vector<32x1xf32>
    %10 = vector.broadcast %9 : vector<32x1xf32> to vector<32x128xf32>
    %11 = arith.addf %8, %10 : vector<32x128xf32>
    %12 = math.tanh %11 : vector<32x128xf32>
    %c0_10 = arith.constant 0 : index
    %c0_11 = arith.constant 0 : index
    %13 = vector.load %arg6[%c0_10, %c0_11] : memref<32x1xf32, #tpu.memory_space<vmem>>, vector<32x1xf32>
    %14 = vector.broadcast %13 : vector<32x1xf32> to vector<32x128xf32>
    %15 = arith.mulf %12, %14 : vector<32x128xf32>
    %cst_12 = arith.constant dense<0.000000e+00> : vector<128xf32>
    %16 = vector.multi_reduction <add>, %15, %cst_12 [0] : vector<32x128xf32> to vector<128xf32>
    %17 = vector.shape_cast %16 : vector<128xf32> to vector<1x128xf32>
    %c0_13 = arith.constant 0 : index
    %18 = memref.load %arg7[%c0_13] : memref<1xf32, #tpu.memory_space<smem>>
    %19 = vector.broadcast %18 : f32 to vector<1x128xf32>
    %20 = arith.addf %17, %19 : vector<1x128xf32>
    %c0_14 = arith.constant 0 : index
    %c0_15 = arith.constant 0 : index
    %21 = vector.load %arg8[%c0_14, %c0_15] : memref<1x128xf32, #tpu.memory_space<vmem>>, vector<1x128xf32>
    tpu.vector_store %arg8[%c0_14, %c0_15], %20 {strides = array<i32>} : memref<1x128xf32, #tpu.memory_space<vmem>>, vector<1x128xf32>,
    return
  }
  func.func @transform_0(%arg0: i32) -> (i32, i32) {
    %c0_i32 = arith.constant 0 : i32
    %c0_i32_0 = arith.constant 0 : i32
    return %arg0, %c0_i32 : i32, i32
  }
  func.func @transform_1(%arg0: i32) -> (i32, i32) {
    %c0_i32 = arith.constant 0 : i32
    %c0_i32_0 = arith.constant 0 : i32
    %c0_i32_1 = arith.constant 0 : i32
    return %c0_i32, %c0_i32_0 : i32, i32
  }
  func.func @transform_2(%arg0: i32) -> (i32, i32) {
    %c0_i32 = arith.constant 0 : i32
    %c0_i32_0 = arith.constant 0 : i32
    %c0_i32_1 = arith.constant 0 : i32
    return %c0_i32, %c0_i32_0 : i32, i32
  }
  func.func @transform_3(%arg0: i32) -> (i32, i32) {
    %c0_i32 = arith.constant 0 : i32
    %c0_i32_0 = arith.constant 0 : i32
    %c0_i32_1 = arith.constant 0 : i32
    return %c0_i32, %c0_i32_0 : i32, i32
  }
  func.func @transform_4(%arg0: i32) -> (i32, i32) {
    %c0_i32 = arith.constant 0 : i32
    %c0_i32_0 = arith.constant 0 : i32
    %c0_i32_1 = arith.constant 0 : i32
    return %c0_i32, %c0_i32_0 : i32, i32
  }
  func.func @transform_5(%arg0: i32) -> (i32, i32) {
    %c0_i32 = arith.constant 0 : i32
    %c0_i32_0 = arith.constant 0 : i32
    %c0_i32_1 = arith.constant 0 : i32
    return %c0_i32, %c0_i32_0 : i32, i32
  }
  func.func @transform_6(%arg0: i32) -> i32 {
    %c0_i32 = arith.constant 0 : i32
    %c0_i32_0 = arith.constant 0 : i32
    return %c0_i32 : i32
  }
  func.func @transform_7(%arg0: i32) -> (i32, i32) {
    %c0_i32 = arith.constant 0 : i32
    %c0_i32_0 = arith.constant 0 : i32
    return %c0_i32, %arg0 : i32, i32
  }
}

</mosaic_0001>

<bundles_post_ra>
// kernel: tpu_custom_call.1
= control target key start
LH: loop header
LB: loop body
LE: loop exit
PB: predicated region body
PF: predicated region fallthrough
CT: control target
= control target key end

     0   :  { %s3335_s0 = inlined_call_operand.vmem [shape: f32[256,16], index: 0, kind: input, shape index: {}]   ;;  %s3336_s1 = inlined_call_operand.vmem [shape: f32[32,16], index: 1, kind: input, shape index: {}]   ;;  %s3337_s2 = inlined_call_operand.vmem [shape: f32[32,1], index: 2, kind: input, shape index: {}]   ;;  %s3338_s3 = inlined_call_operand.vmem [shape: f32[32,32], index: 3, kind: input, shape index: {}]   ;;  %s3339_s4 = inlined_call_operand.vmem [shape: f32[32,1], index: 4, kind: input, shape index: {}]   ;;  %s3340_s5 = inlined_call_operand.vmem [shape: f32[32,1], index: 5, kind: input, shape index: {}]   ;;  %s3341_s6 = inlined_call_operand.<no memory space> [shape: f32[1], index: 6, kind: input, shape index: {}]   ;;  %s3342_s7 = inlined_call_operand.hbm [shape: f32[1,256], index: 7, kind: output, shape index: {}]  }
   0x1   :  { %12 = sst [smem:[#allocation2]] %s3341_s6 }
   0x2   :  { %13 = vsyncpa [#allocation4], 0 }
   0x3   :  { %15 = vsyncpa [#allocation4 + $0x1], 0  ;;  %s2870_s26 = smov 0   ;;  %s2872_s27 = smov 0  }
   0x4   :  { %s2874_s28 = smov 0   ;;  %s2876_s29 = smov 0  }
   0x5 LB: > { %s1925_s6 = sadd.s32 4294967295, %s2823_s29   ;;  %s1926_s30 = sadd.s32 4294967294, %s2823_s29   ;;  %s2823_s29 = sphi %s2876_s29, %s3348_s29   ;;  %s2819_s28 = sphi %s2874_s28, %s3347_s28   ;;  %s2815_s27 = sphi %s2872_s27, %s3346_s27   ;;  %s2811_s26 = sphi %s2870_s26, %s3345_s26  }
   0x6   : > { %s2893_s8 = sadd.s32 1, %s2823_s29   ;;  %s180_s9 = sadd.s32 1, %s2819_s28 }
   0x7   : > { %s177_s10 = ssub.s32 %s2823_s29, %s2893_s8  ;;  %p190_p0 = scmp.ne.s32.totalorder %s2819_s28, %s2815_s27 }
   0x8   : > { %p178_p1 = scmp.eq.s32.totalorder %s177_s10, 0  ;;  %p191_p2 = scmp.eq.s32.totalorder %s1925_s6, 1 }
   0x9   : > { %p196_p3 = scmp.ne.s32.totalorder %s2815_s27, %s2811_s26  ;;  %p197_p4 = scmp.eq.s32.totalorder %s1926_s30, 1 }
   0xa   : > { %s2903_s11 = scalar_select %p178_p1, %s2819_s28, %s180_s9  }
   0xb   : > { %p2905_p5 = por %p191_p2, %p190_p0  ;;  %p2909_p6 = por %p197_p4, %p196_p3 }
   0xc   : > { %p1929_p7 = scmp.ge.s32.totalorder %s2823_s29, 1  ;;  %p242_p8 = scmp.lt.s32.totalorder %s2823_s29, 3 }
   0xe   : > { %p243_p9 = pnand %p1929_p7, %p242_p8 }
   0xf   : > { %s2915_s14 = sshll.u32 (!%p243_p9), %s1925_s6, 4  ;;  %vm323_vm0 = vcmask (!%p243_p9), 130048   ;;  %v295_v0 = vld [vmem:[%s3336_s1] sm:$0xff] (!%p243_p9)  ;;  %vm1186_vm1 = vcmask (!%p243_p9), 261120   ;;  %s1854_s15 = sld [smem:[#allocation2]] (!%p243_p9) }
  0x10   : > { %246 = sbr.rel (%p243_p9) target bundleno = 747 (0x2eb), region = 48  ;;  %p274_p10 = scmp.lt.s32.totalorder (!%p243_p9), %s2915_s14, 31  ;;  %v325_v1 = vsel (!%p243_p9), %vm323_vm0, %v295_v0, 0 }
  0x11   : > { %v2922_v2 = vand.u32 (!%p243_p9), 4294901760, %v325_v1  ;;  %s271_s16 = sand.u32 (!%p243_p9), 1, %s2815_s27   ;;  %s2826_s24 = smov (!%p243_p9), [#allocation3]  }
  0x12   : > { %s1859_s22 = scalar_lea.sflag (!%p243_p9), [#allocation4], %s271_s16  ;;  %s2765_s25 = sshll.u32 (!%p243_p9), %s2826_s24, 4  ;;  %s2766_s25 = int_to_ptr.vmem [resolvable:$false] %s2765_s25 }
  0x13   : > { %v2926_v3 = vsub.f32 (!%p243_p9), %v325_v1, %v2922_v2  ;;  %s2767_s6 = scalar_lea.vmem (!%p243_p9), %s2766_s25, 32 }
  0x15   : > { %v467_v4 = vand.u32 (!%p243_p9), 4294901760, %v2926_v3 }
  0x17   : > { %s275_s17 = scalar_select %p274_p10, %s2915_s14, 31  ;;  %2249 = vmatprep.mubr.f32.mxu0 %v467_v4  ;;  %v468_v23 = vsub.f32 %v2926_v3, %v467_v4 }
  0x19   : > { %s1931_s18 = sshll.u32 %s275_s17, 3  ;;  %v469_v28 = vand.u32 4294901760, %v468_v23  ;;  %s272_s17 = scalar_lea.vmem [#allocation3], %s271_s16 }
  0x1a   : > { %s2931_s21 = scalar_lea.vmem %s3335_s0, %s1931_s18  ;;  %s1871_s18 = sshll.u32 %s272_s17, 4  ;;  %s3295_s18 = int_to_ptr.vmem [resolvable:$true] %s1871_s18 }
  0x1b   : > { %v279_v5 = vld [vmem:[%s2931_s21] sm:$0xff]  ;;  %v280_v6 = vld [vmem:[%s2931_s21 + $0x8] sm:$0xff]  ;;  %v281_v7 = vld [vmem:[%s2931_s21 + $0x10] sm:$0xff]  ;;  %2135 = vmatprep.mubr.f32.mxu1 %v469_v28  ;;  %s2761_s23 = scalar_lea.vmem %s3295_s18, 16  ;;  %p2768_p0 = scmp.lt.s32.totalorder %s3295_s18, %s2766_s25 }
  0x1c   : > { %v337_v8 = vsel %vm323_vm0, %v279_v5, 0  ;;  %v340_v9 = vsel %vm323_vm0, %v280_v6, 0  ;;  %v282_v10 = vld [vmem:[%s2931_s21 + $0x18] sm:$0xff]  ;;  %v343_v11 = vsel %vm323_vm0, %v281_v7, 0  ;;  %v283_v16 = vld [vmem:[%s2931_s21 + $0x20] sm:$0xff]  ;;  %v284_v17 = vld [vmem:[%s2931_s21 + $0x28] sm:$0xff]  ;;  %p2762_p11 = scmp.ne.s32.totalorder %s3295_s18, %s2761_s23  ;;  %p2769_p1 = scmp.lt.s32.totalorder %s2767_s6, %s2761_s23 }
  0x1d   : > { %v385_v12 = vand.u32 4294901760, %v337_v8  ;;  %v388_v13 = vand.u32 4294901760, %v340_v9  ;;  %v346_v14 = vsel %vm323_vm0, %v282_v10, 0  ;;  %v391_v15 = vand.u32 4294901760, %v343_v11  ;;  %v285_v26 = vld [vmem:[%s2931_s21 + $0x30] sm:$0xff]  ;;  %v286_v27 = vld [vmem:[%s2931_s21 + $0x38] sm:$0xff] }
  0x1e   : > { %v394_v18 = vand.u32 4294901760, %v346_v14  ;;  %v349_v21 = vsel %vm323_vm0, %v283_v16, 0  ;;  %v352_v22 = vsel %vm323_vm0, %v284_v17, 0  ;;  %v355_v30 = vsel %vm323_vm0, %v285_v26, 0  ;;  %v287_v34 = vld [vmem:[%s2931_s21 + $0x40] sm:$0xff]  ;;  %v288_v35 = vld [vmem:[%s2931_s21 + $0x48] sm:$0xff]  ;;  %p2763_p12 = pnand %p2762_p11, %p2905_p5  ;;  %p2770_p2 = por %p2769_p1, %p2768_p0 }
  0x1f   : > { %v2944_v19 = vpack.c.bf16 %v388_v13, %v385_v12  ;;  %v397_v24 = vand.u32 4294901760, %v349_v21  ;;  %v400_v25 = vand.u32 4294901760, %v352_v22  ;;  %v358_v31 = vsel %vm323_vm0, %v286_v27, 0  ;;  %v289_v41 = vld [vmem:[%s2931_s21 + $0x50] sm:$0xff]  ;;  %v290_v42 = vld [vmem:[%s2931_s21 + $0x58] sm:$0xff]  ;;  %v291_v63 = vld [vmem:[%s2931_s21 + $0x60] sm:$0xff] }
  0x20   : > { %v2946_v20 = vpack.c.bf16 %v394_v18, %v391_v15  ;;  %v403_v32 = vand.u32 4294901760, %v355_v30  ;;  %v406_v33 = vand.u32 4294901760, %v358_v31  ;;  %v361_v37 = vsel %vm323_vm0, %v287_v34, 0  ;;  %v292_v0 = vld [vmem:[%s2931_s21 + $0x68] sm:$0xff]  ;;  %v298_v28 = vld [vmem:[%s3336_s1 + $0x18] sm:$0xff]  ;;  %p2764_p13 = pneg %p2763_p12 }
  0x21   : > { %2416 = vmatprep.subr.bf16.mxu1 %v2944_v19  ;;  %2512 = vmatprep.subr.bf16.mxu0 %v2944_v19  ;;  %v2959_v29 = vpack.c.bf16 %v400_v25, %v397_v24  ;;  %v364_v38 = vsel %vm323_vm0, %v288_v35, 0  ;;  %v409_v39 = vand.u32 4294901760, %v361_v37  ;;  %v367_v44 = vsel %vm323_vm0, %v289_v41, 0 }
  0x22   : > { %2418 = vmatpush3.bf16.xpose.msra.mxu1 %v2944_v19  ;;  %2514 = vmatpush3.bf16.xpose.msra.mxu0 %v2944_v19  ;;  %v2969_v36 = vpack.c.bf16 %v406_v33, %v403_v32  ;;  %v412_v40 = vand.u32 4294901760, %v364_v38  ;;  %v370_v45 = vsel %vm323_vm0, %v290_v42, 0  ;;  %v2983_v46 = vsub.f32 %v337_v8, %v385_v12  ;;  %v294_v12 = vld [vmem:[%s2931_s21 + $0x78] sm:$0xff]  ;;  %p2771_p3 = pnand %p2770_p2, %p2764_p13 }
  0x23   : > { %2420 = vmatprep.subr.bf16.mxu1 %v2946_v20  ;;  %2516 = vmatprep.subr.bf16.mxu0 %v2946_v20  ;;  %v2985_v47 = vsub.f32 %v340_v9, %v388_v13  ;;  %v2987_v48 = vsub.f32 %v343_v11, %v391_v15  ;;  %v2989_v49 = vsub.f32 %v346_v14, %v394_v18  ;;  %v415_v59 = vand.u32 4294901760, %v367_v44  ;;  %v293_v11 = vld [vmem:[%s2931_s21 + $0x70] sm:$0xff]  ;;  %v296_v14 = vld [vmem:[%s3336_s1 + $0x8] sm:$0xff]  ;;  %s3293_s21 = scalar_lea.hbm %s3342_s7, %s2915_s14 }
  0x24   : > { %v2979_v43 = vpack.c.bf16 %v412_v40, %v409_v39  ;;  %v2991_v50 = vsub.f32 %v349_v21, %v397_v24  ;;  %v2993_v51 = vsub.f32 %v352_v22, %v400_v25  ;;  %v2995_v52 = vsub.f32 %v355_v30, %v403_v32  ;;  %v297_v22 = vld [vmem:[%s3336_s1 + $0x10] sm:$0xff] }
  0x25   : > { %v2997_v53 = vsub.f32 %v358_v31, %v406_v33  ;;  %v2999_v54 = vsub.f32 %v361_v37, %v409_v39  ;;  %v3001_v55 = vsub.f32 %v364_v38, %v412_v40  ;;  %v3005_v56 = vpack.c.bf16 %v2985_v47, %v2983_v46 }
  0x26   : > { %v3009_v57 = vpack.c.bf16 %v2989_v49, %v2987_v48  ;;  %v3015_v58 = vpack.c.bf16 %v2993_v51, %v2991_v50  ;;  %v418_v60 = vand.u32 4294901760, %v370_v45  ;;  %v373_v4 = vsel %vm323_vm0, %v291_v63, 0 }
  0x27   : > { %v3021_v61 = vpack.c.bf16 %v2997_v53, %v2995_v52  ;;  %v3025_v62 = vpack.c.bf16 %v3001_v55, %v2999_v54  ;;  %v376_v5 = vsel %vm323_vm0, %v292_v0, 0  ;;  %v3033_v6 = vsub.f32 %v367_v44, %v415_v59 }
  0x28   : > { %v3029_v1 = vpack.c.bf16 %v418_v60, %v415_v59  ;;  %v3035_v7 = vsub.f32 %v370_v45, %v418_v60  ;;  %v421_v9 = vand.u32 4294901760, %v373_v4  ;;  %v424_v10 = vand.u32 4294901760, %v376_v5 }
  0x29   : > { %v379_v15 = vsel %vm323_vm0, %v293_v11, 0  ;;  %v382_v16 = vsel %vm323_vm0, %v294_v12, 0  ;;  %v328_v21 = vsel %vm323_vm0, %v296_v14, 0  ;;  %v508_v26 = vand.u32 4294901760, %v2983_v46 }
  0x2a   : > { %2422 = vmatpush3.bf16.xpose.msra.mxu1 %v2946_v20  ;;  %2518 = vmatpush3.bf16.xpose.msra.mxu0 %v2946_v20  ;;  %v3041_v8 = vpack.c.bf16 %v3035_v7, %v3033_v6  ;;  %v3047_v13 = vpack.c.bf16 %v424_v10, %v421_v9  ;;  %v3054_v17 = vsub.f32 %v373_v4, %v421_v9  ;;  %v427_v24 = vand.u32 4294901760, %v379_v15 }
  0x2b   : > { %2424 = vmatprep.subr.bf16.mxu1 %v2959_v29  ;;  %2520 = vmatprep.subr.bf16.mxu0 %v2959_v29  ;;  %v3056_v18 = vsub.f32 %v376_v5, %v424_v10  ;;  %v430_v25 = vand.u32 4294901760, %v382_v16  ;;  %v515_v27 = vand.u32 4294901760, %v2985_v47  ;;  %v3075_v30 = vand.u32 4294901760, %v328_v21 }
  0x2c   : > { %v331_v31 = vsel %vm323_vm0, %v297_v22, 0  ;;  %v334_v32 = vsel %vm323_vm0, %v298_v28, 0  ;;  %v509_v34 = vsub.f32 %v2983_v46, %v508_v26  ;;  %v3083_v37 = vsub.f32 %v379_v15, %v427_v24 }
  0x2d   : > { %v3066_v23 = vpack.c.bf16 %v3056_v18, %v3054_v17  ;;  %v3079_v33 = vpack.c.bf16 %v430_v25, %v427_v24  ;;  %v516_v35 = vsub.f32 %v2985_v47, %v515_v27  ;;  %v3085_v38 = vsub.f32 %v382_v16, %v430_v25 }
  0x2e   : > { %v3087_v39 = vand.u32 4294901760, %v331_v31  ;;  %v3090_v40 = vsub.f32 %v328_v21, %v3075_v30  ;;  %v3092_v41 = vand.u32 4294901760, %v334_v32  ;;  %v510_v44 = vand.u32 4294901760, %v509_v34 }
  0x2f   : > { %v3098_v42 = vpack.c.bf16 %v3085_v38, %v3083_v37  ;;  %v517_v45 = vand.u32 4294901760, %v516_v35  ;;  %v522_v46 = vand.u32 4294901760, %v2987_v48  ;;  %v529_v47 = vand.u32 4294901760, %v2989_v49 }
  0x30   : > { %v3105_v59 = vsub.f32 %v331_v31, %v3087_v39  ;;  %v477_v60 = vand.u32 4294901760, %v3090_v40  ;;  %v3109_v63 = vsub.f32 %v334_v32, %v3092_v41  ;;  %v2543_v4 = vpack.c.bf16 %v515_v27, %v508_v26 }
  0x31   : > { %v2447_v0 = vpack.c.bf16 %v517_v45, %v510_v44  ;;  %v523_v5 = vsub.f32 %v2987_v48, %v522_v46  ;;  %v530_v9 = vsub.f32 %v2989_v49, %v529_v47  ;;  %v536_v16 = vand.u32 4294901760, %v2991_v50 }
  0x32   : > { %2426 = vmatpush3.bf16.xpose.msra.mxu1 %v2959_v29  ;;  %2522 = vmatpush3.bf16.xpose.msra.mxu0 %v2959_v29  ;;  %v487_v10 = vand.u32 4294901760, %v3105_v59  ;;  %v478_v11 = vsub.f32 %v3090_v40, %v477_v60  ;;  %v497_v12 = vand.u32 4294901760, %v3109_v63  ;;  %v543_v48 = vand.u32 4294901760, %v2993_v51 }
  0x33   : > { %2428 = vmatprep.subr.bf16.mxu1 %v2969_v36  ;;  %2524 = vmatprep.subr.bf16.mxu0 %v2969_v36  ;;  %v524_v14 = vand.u32 4294901760, %v523_v5  ;;  %v531_v15 = vand.u32 4294901760, %v530_v9  ;;  %v2547_v25 = vpack.c.bf16 %v529_v47, %v522_v46  ;;  %v537_v26 = vsub.f32 %v2991_v50, %v536_v16  ;;  %v299_v50 = vld [vmem:[%s3337_s2] sm:$0xff]  ;;  %v302_v5 = vld [vmem:[%s3337_s2 + $0x18] sm:$0xff] }
  0x34   : > { %v488_v49 = vsub.f32 %v3105_v59, %v487_v10  ;;  %v479_v21 = vand.u32 4294901760, %v478_v11  ;;  %v498_v22 = vsub.f32 %v3109_v63, %v497_v12  ;;  %v544_v27 = vsub.f32 %v2993_v51, %v543_v48  ;;  %v301_v51 = vld [vmem:[%s3337_s2 + $0x10] sm:$0xff]  ;;  %v1162_v11 = vld [vmem:[%s3339_s4] sm:$0xff] }
  0x35   : > { %v2451_v24 = vpack.c.bf16 %v531_v15, %v524_v14  ;;  %v538_v32 = vand.u32 4294901760, %v537_v26  ;;  %v550_v35 = vand.u32 4294901760, %v2995_v52  ;;  %v557_v44 = vand.u32 4294901760, %v2997_v53  ;;  %v1818_v26 = vld [vmem:[%s3340_s5 + $0x8] sm:$0xff] }
  0x36   : > { %v489_v28 = vand.u32 4294901760, %v488_v49  ;;  %v499_v31 = vand.u32 4294901760, %v498_v22  ;;  %v545_v34 = vand.u32 4294901760, %v544_v27  ;;  %v2551_v45 = vpack.c.bf16 %v543_v48, %v536_v16  ;;  %v1164_v49 = vld [vmem:[%s3339_s4 + $0x10] sm:$0xff] }
  0x37   : > { %v551_v47 = vsub.f32 %v2995_v52, %v550_v35  ;;  %v2555_v15 = vpack.c.bf16 %v557_v44, %v550_v35  ;;  %v1820_v35 = vld [vmem:[%s3340_s5 + $0x18] sm:$0xff] }
  0x38   : > { %v2455_v46 = vpack.c.bf16 %v545_v34, %v538_v32  ;;  %v1819_v34 = vld [vmem:[%s3340_s5 + $0x10] sm:$0xff] }
  0x39   : > { %v552_v52 = vand.u32 4294901760, %v551_v47 }
  0x3a   : > { %2430 = vmatpush3.bf16.xpose.msra.mxu1 %v2969_v36  ;;  %2526 = vmatpush3.bf16.xpose.msra.mxu0 %v2969_v36 }
  0x3b   : > { %2432 = vmatprep.subr.bf16.mxu1 %v2979_v43  ;;  %2528 = vmatprep.subr.bf16.mxu0 %v2979_v43 }
  0x42   : > { %2434 = vmatpush3.bf16.xpose.msra.mxu1 %v2979_v43  ;;  %2530 = vmatpush3.bf16.xpose.msra.mxu0 %v2979_v43 }
  0x43   : > { %2436 = vmatprep.subr.bf16.mxu1 %v3029_v1  ;;  %2532 = vmatprep.subr.bf16.mxu0 %v3029_v1 }
  0x4a   : > { %2438 = vmatpush3.bf16.xpose.msra.mxu1 %v3029_v1  ;;  %2534 = vmatpush3.bf16.xpose.msra.mxu0 %v3029_v1 }
  0x4b   : > { %2440 = vmatprep.subr.bf16.mxu1 %v3047_v13  ;;  %2536 = vmatprep.subr.bf16.mxu0 %v3047_v13 }
  0x52   : > { %2442 = vmatpush3.bf16.xpose.msra.mxu1 %v3047_v13  ;;  %2538 = vmatpush3.bf16.xpose.msra.mxu0 %v3047_v13 }
  0x53   : > { %2444 = vmatprep.subr.bf16.mxu1 %v3079_v33  ;;  %2540 = vmatprep.subr.bf16.mxu0 %v3079_v33 }
  0x5a   : > { %2446 = vmatpush3.bf16.xpose.msra.mxu1 %v3079_v33  ;;  %2542 = vmatpush3.bf16.xpose.msra.mxu0 %v3079_v33 }
  0x5b   : > { %2448 = vmatprep.subr.bf16.mxu1 %v2447_v0  ;;  %2544 = vmatprep.subr.bf16.mxu0 %v2543_v4 }
  0x61   : > { %2136 = vmatmul.mubr.f32.vlgmr.msra.gmra.mrb[0].mxu1 %v479_v21  ;;  %2250 = vmatmul.mubr.f32.vlgmr.msra.gmra.mrb[0].mxu0 %v477_v60  ;;  %v558_v60 = vsub.f32 %v2997_v53, %v557_v44  ;;  %v564_v53 = vand.u32 4294901760, %v2999_v54  ;;  %v1165_v21 = vld [vmem:[%s3339_s4 + $0x18] sm:$0xff] }
  0x62   : > { %2450 = vmatpush3.bf16.xpose.msra.mxu1 %v2447_v0  ;;  %2546 = vmatpush3.bf16.xpose.msra.mxu0 %v2543_v4  ;;  %v2825_v0 = vmov 0   ;;  %v300_v4 = vld [vmem:[%s3337_s2 + $0x8] sm:$0xff] }
  0x63   : > { %2452 = vmatprep.subr.bf16.mxu1 %v2451_v24  ;;  %2548 = vmatprep.subr.bf16.mxu0 %v2547_v25  ;;  %v559_v9 = vand.u32 4294901760, %v558_v60  ;;  %v565_v16 = vsub.f32 %v2999_v54, %v564_v53  ;;  %v578_v54 = vand.u32 4294901760, %v3033_v6 }
  0x64   : > { %2138 = vmatprep.mubr.f32.mxu1 %v489_v28  ;;  %2252 = vmatprep.mubr.f32.mxu0 %v487_v10  ;;  %v571_v10 = vand.u32 4294901760, %v3001_v55 }
  0x65   : > { %2139 = vmatmul.mubr.f32.gmra.mrb[2].mxu1 %v499_v31  ;;  %2253 = vmatmul.mubr.f32.gmra.mrb[2].mxu0 %v497_v12  ;;  %v1163_v12 = vld [vmem:[%s3339_s4 + $0x8] sm:$0xff]  ;;  %v2459_v14 = vpack.c.bf16 %v559_v9, %v552_v52  ;;  %v566_v22 = vand.u32 4294901760, %v565_v16  ;;  %v579_v31 = vsub.f32 %v3033_v6, %v578_v54  ;;  %v592_v6 = vand.u32 4294901760, %v3054_v17 }
  0x66   : > { %2173 = vmatprep.mubr.f32.mxu1 %v2922_v2  ;;  %2287 = vmatprep.mubr.f32.mxu0 %v2922_v2  ;;  %v572_v48 = vsub.f32 %v3001_v55, %v571_v10  ;;  %v585_v55 = vand.u32 4294901760, %v3035_v7  ;;  %v2559_v28 = vpack.c.bf16 %v571_v10, %v564_v53 }
  0x67   : > { %2743 = vset.pattern.permute.xlu0 %v2825_v0  ;;  %2744 = vset.pattern.permute.xlu1 %v2825_v0  ;;  %v580_v44 = vand.u32 4294901760, %v579_v31 }
  0x68   : > { %305 = vperm.xlu0 %2743, %v299_v50   ;;  %315 = vperm.xlu1 %2744, %v301_v51   ;;  %v586_v32 = vsub.f32 %v3035_v7, %v585_v55  ;;  %v599_v7 = vand.u32 4294901760, %v3056_v18 }
  0x6a   : > { %2454 = vmatpush3.bf16.xpose.msra.mxu1 %v2451_v24  ;;  %2550 = vmatpush3.bf16.xpose.msra.mxu0 %v2547_v25  ;;  %v573_v24 = vand.u32 4294901760, %v572_v48  ;;  %v1817_v25 = vld [vmem:[%s3340_s5] sm:$0xff]  ;;  %v587_v50 = vand.u32 4294901760, %v586_v32  ;;  %v600_v47 = vsub.f32 %v3056_v18, %v599_v7  ;;  %v2567_v9 = vpack.c.bf16 %v599_v7, %v592_v6 }
  0x6b   : > { %2456 = vmatprep.subr.bf16.mxu1 %v2455_v46  ;;  %2552 = vmatprep.subr.bf16.mxu0 %v2551_v45 }
  0x6c   : > { %310 = vperm.xlu0 %2743, %v300_v4   ;;  %320 = vperm.xlu1 %2744, %v302_v5   ;;  %v2463_v27 = vpack.c.bf16 %v573_v24, %v566_v22  ;;  %v2467_v51 = vpack.c.bf16 %v587_v50, %v580_v44  ;;  %v601_v0 = vand.u32 4294901760, %v600_v47  ;;  %v606_v4 = vand.u32 4294901760, %v3083_v37 }
  0x6d   : > { %v613_v5 = vand.u32 4294901760, %v3085_v38 }
  0x6e   : > { %v607_v53 = vsub.f32 %v3083_v37, %v606_v4 }
  0x6f   : > { %v614_v10 = vsub.f32 %v3085_v38, %v613_v5 }
  0x70   : > { %1168 = vperm.xlu0 %2743, %v1162_v11   ;;  %1173 = vperm.xlu1 %2744, %v1163_v12   ;;  %v2571_v12 = vpack.c.bf16 %v613_v5, %v606_v4 }
  0x71   : > { %v615_v18 = vand.u32 4294901760, %v614_v10 }
  0x72   : > { %2458 = vmatpush3.bf16.xpose.msra.mxu1 %v2455_v46  ;;  %2554 = vmatpush3.bf16.xpose.msra.mxu0 %v2551_v45  ;;  %v2563_v45 = vpack.c.bf16 %v585_v55, %v578_v54  ;;  %v593_v46 = vsub.f32 %v3054_v17, %v592_v6  ;;  %v608_v17 = vand.u32 4294901760, %v607_v53 }
  0x73   : > { %2460 = vmatprep.subr.bf16.mxu1 %v2459_v14  ;;  %2556 = vmatprep.subr.bf16.mxu0 %v2555_v15 }
  0x74   : > { %1178 = vperm.xlu0 %2743, %v1164_v49   ;;  %1183 = vperm.xlu1 %2744, %v1165_v21   ;;  %v594_v60 = vand.u32 4294901760, %v593_v46  ;;  %v2475_v11 = vpack.c.bf16 %v615_v18, %v608_v17  ;;  %v1161_v49 = vld [vmem:[%s3338_s3 + $0x18] sm:$0xff] }
  0x75   : > { %v1197_v54 = vsel %vm1186_vm1, %v1161_v49, 0 }
  0x76   : > { %v2471_v52 = vpack.c.bf16 %v601_v0, %v594_v60 }
  0x78   : > { %1823 = vperm.xlu0 %2743, %v1817_v25   ;;  %1828 = vperm.xlu1 %2744, %v1818_v26   ;;  %v3258_v25 = vand.u32 4294901760, %v1197_v54 }
  0x7a   : > { %2462 = vmatpush3.bf16.xpose.msra.mxu1 %v2459_v14  ;;  %2558 = vmatpush3.bf16.xpose.msra.mxu0 %v2555_v15 }
  0x7b   : > { %2464 = vmatprep.subr.bf16.mxu1 %v2463_v27  ;;  %2560 = vmatprep.subr.bf16.mxu0 %v2559_v28 }
  0x7c   : > { %1833 = vperm.xlu0 %2743, %v1819_v34   ;;  %1838 = vperm.xlu1 %2744, %v1820_v35   ;;  %v3265_v35 = vsub.f32 %v1197_v54, %v3258_v25 }
  0x7e   : > { %v1300_v5 = vand.u32 4294901760, %v3265_v35 }
  0x82   : > { %2466 = vmatpush3.bf16.xpose.msra.mxu1 %v2463_v27  ;;  %2562 = vmatpush3.bf16.xpose.msra.mxu0 %v2559_v28 }
  0x83   : > { %2468 = vmatprep.subr.bf16.mxu1 %v2467_v51  ;;  %2564 = vmatprep.subr.bf16.mxu0 %v2563_v45 }
  0x8a   : > { %2470 = vmatpush3.bf16.xpose.msra.mxu1 %v2467_v51  ;;  %2566 = vmatpush3.bf16.xpose.msra.mxu0 %v2563_v45 }
  0x8b   : > { %2472 = vmatprep.subr.bf16.mxu1 %v2471_v52  ;;  %2568 = vmatprep.subr.bf16.mxu0 %v2567_v9 }
  0x92   : > { %2474 = vmatpush3.bf16.xpose.msra.mxu1 %v2471_v52  ;;  %2570 = vmatpush3.bf16.xpose.msra.mxu0 %v2567_v9 }
  0x93   : > { %2476 = vmatprep.subr.bf16.mxu1 %v2475_v11  ;;  %2572 = vmatprep.subr.bf16.mxu0 %v2571_v12 }
  0x9a   : > { %2478 = vmatpush3.bf16.xpose.msra.mxu1 %v2475_v11  ;;  %2574 = vmatpush3.bf16.xpose.msra.mxu0 %v2571_v12 }
  0x9b   : > { %2480 = vmatprep.subr.bf16.mxu1 %v3005_v56  ;;  %2576 = vmatprep.subr.bf16.mxu0 %v2944_v19 }
  0xa1   : > { %2174 = vmatmul.mubr.f32.vlgmr.msra.gmra.mrb[0].mxu1 %v3075_v30  ;;  %2288 = vmatmul.mubr.f32.vlgmr.msra.gmra.mrb[0].mxu0 %v3075_v30 }
  0xa2   : > { %2482 = vmatpush3.bf16.xpose.msra.mxu1 %v3005_v56  ;;  %2578 = vmatpush3.bf16.xpose.msra.mxu0 %v2944_v19 }
  0xa3   : > { %2484 = vmatprep.subr.bf16.mxu1 %v3009_v57  ;;  %2580 = vmatprep.subr.bf16.mxu0 %v2946_v20 }
  0xa4   : > { %2176 = vmatprep.mubr.f32.mxu1 %v3087_v39  ;;  %2290 = vmatprep.mubr.f32.mxu0 %v3087_v39 }
  0xa5   : > { %2177 = vmatmul.mubr.f32.gmra.mrb[2].mxu1 %v3092_v41  ;;  %2291 = vmatmul.mubr.f32.gmra.mrb[2].mxu0 %v3092_v41 }
  0xa6   : > { %2211 = vmatprep.mubr.f32.mxu1 %v2926_v3  ;;  %2325 = vmatprep.mubr.f32.mxu0 %v2922_v2  ;;  %v1158_v2 = vld [vmem:[%s3338_s3] sm:$0xff] }
  0xa7   : > { %v1188_v3 = vsel %vm1186_vm1, %v1158_v2, 0 }
  0xa8   : > { %v3232_v19 = vand.u32 4294901760, %v1188_v3 }
  0xaa   : > { %2486 = vmatpush3.bf16.xpose.msra.mxu1 %v3009_v57  ;;  %2582 = vmatpush3.bf16.xpose.msra.mxu0 %v2946_v20  ;;  %v3235_v20 = vsub.f32 %v1188_v3, %v3232_v19 }
  0xab   : > { %2488 = vmatprep.subr.bf16.mxu1 %v3015_v58  ;;  %2584 = vmatprep.subr.bf16.mxu0 %v2959_v29 }
  0xb2   : > { %2490 = vmatpush3.bf16.xpose.msra.mxu1 %v3015_v58  ;;  %2586 = vmatpush3.bf16.xpose.msra.mxu0 %v2959_v29  ;;  %v1270_v29 = vand.u32 4294901760, %v3235_v20 }
  0xb3   : > { %2492 = vmatprep.subr.bf16.mxu1 %v3021_v61  ;;  %2588 = vmatprep.subr.bf16.mxu0 %v2969_v36 }
  0xba   : > { %2494 = vmatpush3.bf16.xpose.msra.mxu1 %v3021_v61  ;;  %2590 = vmatpush3.bf16.xpose.msra.mxu0 %v2969_v36  ;;  %v1271_v36 = vsub.f32 %v3235_v20, %v1270_v29 }
  0xbb   : > { %2496 = vmatprep.subr.bf16.mxu1 %v3025_v62  ;;  %2592 = vmatprep.subr.bf16.mxu0 %v2979_v43 }
  0xc2   : > { %2498 = vmatpush3.bf16.xpose.msra.mxu1 %v3025_v62  ;;  %2594 = vmatpush3.bf16.xpose.msra.mxu0 %v2979_v43  ;;  %v1272_v43 = vand.u32 4294901760, %v1271_v36 }
  0xc3   : > { %2500 = vmatprep.subr.bf16.mxu1 %v3041_v8  ;;  %2596 = vmatprep.subr.bf16.mxu0 %v3029_v1 }
  0xca   : > { %2502 = vmatpush3.bf16.xpose.msra.mxu1 %v3041_v8  ;;  %2598 = vmatpush3.bf16.xpose.msra.mxu0 %v3029_v1 }
  0xcb   : > { %2504 = vmatprep.subr.bf16.mxu1 %v3066_v23  ;;  %2600 = vmatprep.subr.bf16.mxu0 %v3047_v13 }
  0xd2   : > { %2506 = vmatpush3.bf16.xpose.msra.mxu1 %v3066_v23  ;;  %2602 = vmatpush3.bf16.xpose.msra.mxu0 %v3047_v13 }
  0xd3   : > { %2508 = vmatprep.subr.bf16.mxu1 %v3098_v42  ;;  %2604 = vmatprep.subr.bf16.mxu0 %v3079_v33 }
  0xda   : > { %2510 = vmatpush3.bf16.xpose.msra.mxu1 %v3098_v42  ;;  %2606 = vmatpush3.bf16.xpose.msra.mxu0 %v3079_v33 }
  0xe1   : > { %2212 = vmatmul.mubr.f32.vlgmr.msra.gmra.mrb[0].mxu1 %v3090_v40  ;;  %2326 = vmatmul.mubr.f32.vlgmr.msra.gmra.mrb[0].mxu0 %v3075_v30  ;;  %v1159_v30 = vld [vmem:[%s3338_s3 + $0x8] sm:$0xff] }
  0xe2   : > { %2214 = vmatprep.mubr.f32.mxu1 %v3105_v59  ;;  %2328 = vmatprep.mubr.f32.mxu0 %v3087_v39  ;;  %v1191_v14 = vsel %vm1186_vm1, %v1159_v30, 0 }
  0xe3   : > { %v3250_v22 = vand.u32 4294901760, %v1191_v14 }
  0xe5   : > { %2215 = vmatmul.mubr.f32.gmra.mrb[2].mxu1 %v3109_v63  ;;  %2329 = vmatmul.mubr.f32.gmra.mrb[2].mxu0 %v3092_v41  ;;  %v1160_v41 = vld [vmem:[%s3338_s3 + $0x10] sm:$0xff]  ;;  %v3256_v55 = vsub.f32 %v1191_v14, %v3250_v22 }
  0xe6   : > { %2381 = vmatprep.mubr.f32.mxu1 %v1270_v29  ;;  %2339 = vmatprep.mubr.f32.mxu0 %v1272_v43  ;;  %v1194_v48 = vsel %vm1186_vm1, %v1160_v41, 0 }
  0xe7   : > { %v306_v56 = vpop.permute.xlu0 %305  ;;  %v316_v57 = vpop.permute.xlu1 %315  ;;  %v3252_v24 = vand.u32 4294901760, %v1194_v48  ;;  %v1280_v32 = vand.u32 4294901760, %v3256_v55 }
  0xe9   : > { %v3261_v26 = vsub.f32 %v1194_v48, %v3252_v24  ;;  %v1281_v60 = vsub.f32 %v3256_v55, %v1280_v32 }
  0xeb   : > { %v311_v58 = vpop.permute.xlu0 %310  ;;  %v321_v33 = vpop.permute.xlu1 %320  ;;  %v1290_v50 = vand.u32 4294901760, %v3261_v26  ;;  %v1282_v2 = vand.u32 4294901760, %v1281_v60 }
  0xed   : > { %v1291_v10 = vsub.f32 %v3261_v26, %v1290_v50 }
 0x1b4   : > { %v2213_v61 = vpop.f32.mrb[0].mxu1  ;;  %v2327_v62 = vpop.f32.mrb[0].mxu0 }
 0x1b5   : > { %v2655_v1 = vadd.f32 %v2213_v61, %v311_v58  ;;  %v774_v8 = vpop.f32.mrb[1].mxu1  ;;  %v1132_v13 = vpop.f32.mrb[1].mxu0 }
 0x1b6   : > { %v2657_v23 = vadd.f32 %v774_v8, %v306_v56  ;;  %v1301_v56 = vsub.f32 %v3265_v35, %v1300_v5 }
 0x1b7   : > { %v2656_v37 = vadd.f32 %v2655_v1, %v2327_v62  ;;  %v1292_v1 = vand.u32 4294901760, %v1291_v10 }
 0x1b8   : > { %v2658_v38 = vadd.f32 %v2657_v23, %v1132_v13  ;;  %v2216_v39 = vpop.f32.mrb[2].mxu1  ;;  %v2330_v40 = vpop.f32.mrb[2].mxu0  ;;  %v1302_v23 = vand.u32 4294901760, %v1301_v56 }
 0x1b9   : > { %2745 = vtanh.f32 %v2656_v37  ;;  %v2659_v42 = vadd.f32 %v2216_v39, %v321_v33  ;;  %v788_v59 = vpop.f32.mrb[3].mxu1  ;;  %v1144_v63 = vpop.f32.mrb[3].mxu0 }
 0x1ba   : > { %2747 = vtanh.f32 %v2658_v38  ;;  %v2661_v15 = vadd.f32 %v788_v59, %v316_v57  ;;  %v1169_v37 = vpop.permute.xlu0 %1168  ;;  %v1174_v38 = vpop.permute.xlu1 %1173 }
 0x1bb   : > { %v2660_v16 = vadd.f32 %v2659_v42, %v2330_v40 }
 0x1bc   : > { %v2662_v21 = vadd.f32 %v2661_v15, %v1144_v63 }
 0x1bd   : > { %2749 = vtanh.f32 %v2660_v16 }
 0x1be   : > { %2751 = vtanh.f32 %v2662_v21  ;;  %v1179_v59 = vpop.permute.xlu0 %1178  ;;  %v1184_v14 = vpop.permute.xlu1 %1183 }
 0x1c3   : > { %v2746_v27 = vpop.eup %2745 }
 0x1c4   : > { %v2748_v28 = vpop.eup %2747  ;;  %v1203_v31 = vand.u32 4294901760, %v2746_v27 }
 0x1c5   : > { %v1200_v34 = vand.u32 4294901760, %v2748_v28 }
 0x1c6   : > { %v1317_v44 = vsub.f32 %v2746_v27, %v1203_v31  ;;  %v1829_v27 = vpop.permute.xlu1 %1828 }
 0x1c7   : > { %v2750_v6 = vpop.eup %2749  ;;  %v2607_v7 = vpack.c.bf16 %v1203_v31, %v1200_v34  ;;  %v1310_v51 = vsub.f32 %v2748_v28, %v1200_v34 }
 0x1c8   : > { %v2752_v45 = vpop.eup %2751  ;;  %v1209_v46 = vand.u32 4294901760, %v2750_v6  ;;  %v1318_v47 = vand.u32 4294901760, %v1317_v44 }
 0x1c9   : > { %v1206_v0 = vand.u32 4294901760, %v2752_v45  ;;  %2608 = vmatprep.subr.bf16.mxu0 %v2607_v7  ;;  %2632 = vmatprep.subr.bf16.mxu1 %v2607_v7  ;;  %v1311_v4 = vand.u32 4294901760, %v1310_v51  ;;  %v2623_v52 = vpack.c.bf16 %v1317_v44, %v1310_v51 }
 0x1ca   : > { %2610 = vmatpush3.bf16.msra.mxu0 %v2607_v7  ;;  %2634 = vmatpush3.bf16.msra.mxu1 %v2607_v7  ;;  %v1319_v9 = vsub.f32 %v1317_v44, %v1318_v47  ;;  %v1331_v53 = vsub.f32 %v2750_v6, %v1209_v46 }
 0x1cb   : > { %v2611_v17 = vpack.c.bf16 %v1209_v46, %v1206_v0  ;;  %v2639_v18 = vpack.c.bf16 %v1318_v47, %v1311_v4  ;;  %v1312_v11 = vsub.f32 %v1310_v51, %v1311_v4  ;;  %v1324_v12 = vsub.f32 %v2752_v45, %v1206_v0 }
 0x1cc   : > { %v1320_v3 = vand.u32 4294901760, %v1319_v9  ;;  %v1332_v29 = vand.u32 4294901760, %v1331_v53 }
 0x1cd   : > { %2612 = vmatprep.subr.bf16.mxu0 %v2611_v17  ;;  %2636 = vmatprep.subr.bf16.mxu1 %v2611_v17  ;;  %v1313_v36 = vand.u32 4294901760, %v1312_v11  ;;  %v1325_v43 = vand.u32 4294901760, %v1324_v12  ;;  %v2627_v57 = vpack.c.bf16 %v1331_v53, %v1324_v12 }
 0x1ce   : > { %2614 = vmatpush3.bf16.msra.mxu0 %v2611_v17  ;;  %2638 = vmatpush3.bf16.msra.mxu1 %v2611_v17  ;;  %v1333_v58 = vsub.f32 %v1331_v53, %v1332_v29 }
 0x1cf   : > { %2640 = vmatprep.subr.bf16.mxu1 %v2639_v18  ;;  %v2615_v61 = vpack.c.bf16 %v1320_v3, %v1313_v36  ;;  %v2643_v62 = vpack.c.bf16 %v1332_v29, %v1325_v43  ;;  %v1326_v8 = vsub.f32 %v1324_v12, %v1325_v43 }
 0x1d0   : > { %v1334_v13 = vand.u32 4294901760, %v1333_v58 }
 0x1d1   : > { %2340 = vmatmul.mubr.f32.vlgmr.msra.gmra.mrb[4].mxu0 %v1282_v2  ;;  %2616 = vmatprep.subr.bf16.mxu0 %v2615_v61  ;;  %v1327_v30 = vand.u32 4294901760, %v1326_v8 }
 0x1d2   : > { %2382 = vmatmul.mubr.f32.vlgmr.msra.gmra.mrb[4].mxu1 %v1280_v32  ;;  %2618 = vmatpush3.bf16.msra.mxu0 %v2615_v61 }
 0x1d3   : > { %2642 = vmatpush3.bf16.msra.mxu1 %v2639_v18  ;;  %2342 = vmatprep.mubr.f32.mxu0 %v1292_v1  ;;  %v2619_v33 = vpack.c.bf16 %v1334_v13, %v1327_v30 }
 0x1d4   : > { %2644 = vmatprep.subr.bf16.mxu1 %v2643_v62  ;;  %2384 = vmatprep.mubr.f32.mxu1 %v1290_v50 }
 0x1d5   : > { %2343 = vmatmul.mubr.f32.gmra.mrb[6].mxu0 %v1302_v23  ;;  %2620 = vmatprep.subr.bf16.mxu0 %v2619_v33 }
 0x1d6   : > { %2385 = vmatmul.mubr.f32.gmra.mrb[6].mxu1 %v1300_v5  ;;  %2622 = vmatpush3.bf16.msra.mxu0 %v2619_v33 }
 0x1d7   : > { %2646 = vmatpush3.bf16.msra.mxu1 %v2643_v62  ;;  %2624 = vmatprep.subr.bf16.mxu0 %v2623_v52 }
 0x1d8   : > { %2648 = vmatprep.subr.bf16.mxu1 %v2607_v7  ;;  %2353 = vmatprep.mubr.f32.mxu0 %v3232_v19 }
 0x1d9   : > { %2395 = vmatprep.mubr.f32.mxu1 %v3232_v19  ;;  %2354 = vmatmul.mubr.f32.vlgmr.msra.gmra.mrb[4].mxu0 %v3250_v22 }
 0x1da   : > { %2396 = vmatmul.mubr.f32.vlgmr.msra.gmra.mrb[4].mxu1 %v3250_v22  ;;  %2626 = vmatpush3.bf16.msra.mxu0 %v2623_v52  ;;  %v1855_v52 = vstv %s1854_s15 }
 0x1db   : > { %2650 = vmatpush3.bf16.msra.mxu1 %v2607_v7  ;;  %2628 = vmatprep.subr.bf16.mxu0 %v2627_v57  ;;  %v1839_v7 = vpop.permute.xlu1 %1838 }
 0x1dc   : > { %2652 = vmatprep.subr.bf16.mxu1 %v2611_v17  ;;  %2356 = vmatprep.mubr.f32.mxu0 %v3252_v24 }
 0x1dd   : > { %2398 = vmatprep.mubr.f32.mxu1 %v3252_v24  ;;  %2357 = vmatmul.mubr.f32.gmra.mrb[6].mxu0 %v3258_v25 }
 0x1de   : > { %2399 = vmatmul.mubr.f32.gmra.mrb[6].mxu1 %v3258_v25  ;;  %2630 = vmatpush3.bf16.msra.mxu0 %v2627_v57 }
 0x1df   : > { %2654 = vmatpush3.bf16.msra.mxu1 %v2611_v17  ;;  %2367 = vmatprep.mubr.f32.mxu0 %v3235_v20 }
 0x1e0   : > { %2409 = vmatprep.mubr.f32.mxu1 %v3232_v19 }
 0x1e1   : > { %2368 = vmatmul.mubr.f32.vlgmr.msra.gmra.mrb[4].mxu0 %v3256_v55 }
 0x1e2   : > { %2410 = vmatmul.mubr.f32.vlgmr.msra.gmra.mrb[4].mxu1 %v3250_v22  ;;  %2370 = vmatprep.mubr.f32.mxu0 %v3261_v26 }
 0x1e3   : > { %2412 = vmatprep.mubr.f32.mxu1 %v3252_v24 }
 0x1e5   : > { %2371 = vmatmul.mubr.f32.gmra.mrb[6].mxu0 %v3265_v35 }
 0x1e6   : > { %2413 = vmatmul.mubr.f32.gmra.mrb[6].mxu1 %v3258_v25  ;;  %v1824_v25 = vpop.permute.xlu0 %1823 }
 0x1ea   : > { %v1834_v50 = vpop.permute.xlu0 %1833 }
 0x2b4   : > { %v2369_v39 = vpop.f32.mrb[4].mxu0 }
 0x2b5   : > { %v2663_v40 = vadd.f32 %v2369_v39, %v1174_v38  ;;  %v2411_v41 = vpop.f32.mrb[4].mxu1  ;;  %v1493_v20 = vpop.f32.mrb[5].mxu0 }
 0x2b6   : > { %v2665_v42 = vadd.f32 %v1493_v20, %v1169_v37  ;;  %v1791_v19 = vpop.f32.mrb[5].mxu1 }
 0x2b7   : > { %v2664_v63 = vadd.f32 %v2663_v40, %v2411_v41 }
 0x2b8   : > { %v2666_v15 = vadd.f32 %v2665_v42, %v1791_v19  ;;  %v2372_v16 = vpop.f32.mrb[6].mxu0 }
 0x2b9   : > { %2753 = vtanh.f32 %v2664_v63  ;;  %v2667_v48 = vadd.f32 %v2372_v16, %v1184_v14  ;;  %v2414_v49 = vpop.f32.mrb[6].mxu1  ;;  %v1507_v21 = vpop.f32.mrb[7].mxu0 }
 0x2ba   : > { %2755 = vtanh.f32 %v2666_v15  ;;  %v2669_v22 = vadd.f32 %v1507_v21, %v1179_v59  ;;  %v1803_v24 = vpop.f32.mrb[7].mxu1 }
 0x2bb   : > { %v2668_v54 = vadd.f32 %v2667_v48, %v2414_v49 }
 0x2bc   : > { %v2670_v55 = vadd.f32 %v2669_v22, %v1803_v24 }
 0x2bd   : > { %2757 = vtanh.f32 %v2668_v54 }
 0x2be   : > { %2759 = vtanh.f32 %v2670_v55 }
 0x2c3   : > { %v2754_v26 = vpop.eup %2753 }
 0x2c4   : > { %v2756_v28 = vpop.eup %2755  ;;  %v1842_v31 = vmul.f32 %v2754_v26, %v1829_v27 }
 0x2c5   : > { %v1841_v32 = vmul.f32 %v2756_v28, %v1824_v25 }
 0x2c7   : > { %v2758_v34 = vpop.eup %2757  ;;  %v1845_v35 = vadd.f32 %v1842_v31, %v1841_v32 }
 0x2c8   : > { %v2760_v44 = vpop.eup %2759  ;;  %v1844_v51 = vmul.f32 %v2758_v34, %v1839_v7 }
 0x2c9   : > { %v1843_v6 = vmul.f32 %v2760_v44, %v1834_v50 }
 0x2cb   : > { %v1846_v45 = vadd.f32 %v1845_v35, %v1843_v6 }
 0x2cd   : > { %v1847_v46 = vadd.f32 %v1846_v45, %v1844_v51 }
 0x2cf   : > { %v1848_v47 = vrot.slane %v1847_v46, 4 }
 0x2d1   : > { %v1849_v60 = vadd.f32 %v1848_v47, %v1847_v46 }
 0x2d3   : > { %v1850_v0 = vrot.slane %v1849_v60, 2 }
 0x2d5   : > { %v1851_v4 = vadd.f32 %v1850_v0, %v1849_v60 }
 0x2d7   : > { %v1852_v5 = vrot.slane %v1851_v4, 1 }
 0x2d9   : > { %v1853_v9 = vadd.f32 %v1852_v5, %v1851_v4 }
 0x2db   : > { %v1856_v53 = vadd.f32 %v1855_v52, %v1853_v9 }
 0x2dd   : > { %1857 = vst [vmem:[%s272_s17] sm:$0x1] %v1856_v53 }
 0x2de   : > { %2774 = shalt.err (!%p2771_p3)
}
 0x2df   : > { %s2775_s14 = scalar_lea.hbm %s3293_s21, 16  ;;  %s2779_s10 = scalar_lea.hbm %s3342_s7, 32 }
 0x2e0   : > { %p2776_p4 = scmp.ne.s32.totalorder %s3293_s21, %s2775_s14  ;;  %p2780_p9 = scmp.lt.u32.totalorder %s3293_s21, %s3342_s7 }
 0x2e1   : > { %p2781_p10 = scmp.lt.u32.totalorder %s2779_s10, %s2775_s14  ;;  %p2783_p12 = scmp.lt.u32.totalorder %s2775_s14, %s3293_s21 }
 0x2e2   : > { %p2777_p7 = pnand %p2776_p4, %p2905_p5 }
 0x2e3   : > { %p2782_p11 = por %p2781_p10, %p2780_p9 }
 0x2e4   : > { %p2778_p8 = pneg %p2777_p7 }
 0x2e5   : > { %p2784_p13 = por %p2783_p12, %p2782_p11 }
 0x2e7   : > { %p2785_p0 = pnand %p2784_p13, %p2778_p8 }
 0x2e9   : > { %2788 = shalt.err (!%p2785_p0)
}
 0x2ea   : > { %2703 = dma.vmem_to_hbm [thread:$0]  (%p2905_p5), %s3295_s18, 16, %s3293_s21, %s1859_s22  }
 0x2eb PF: > { %p2709_p1 = scmp.ge.s32.totalorder %s2823_s29, 2  ;;  %s1883_s17 = sand.u32 1, %s2811_s26  }
 0x2ec   : > { %s1884_s19 = scalar_lea.sflag [#allocation4], %s1883_s17 }
 0x2ed   : > { %p2706_p2 = pnand %p2709_p1, %p2909_p6 }
 0x2ef   : > { %2806 = dma.done.wait (!%p2706_p2), %s1884_s19, 16  }
 0x2f0   : > { %2808 = vsyncadd (!%p2706_p2), %s1884_s19, 4294967280  ;;  %p18_p3 = scmp.ge.s32.totalorder %s2893_s8, 4   ;;  %s3345_s26 = smov %s2815_s27 }
 0x2f1   : > { %s3346_s27 = smov %s2819_s28  ;;  %s3347_s28 = smov %s2903_s11 }
 0x2f2   : > { %s3348_s29 = smov %s2893_s8  ;;  %20 = sbr.rel (!%p18_p3) target bundleno = 5 (0x5), region = 83 }
 0x2f9   :  { %1888 = vsyncpa [#allocation4], 1 }
 0x2fa   :  { %1890 = vsyncpa [#allocation4 + $0x1], 1 }

</bundles_post_ra>
